<compile_context>
chip_gen: v7x
topology: tpu7x:2x2x1
jax: 0.10.0
libtpu: 0.0.40
codegen_flags: <defaults>
</compile_context>

<pallas_src>
import functools

import jax
import jax.numpy as jnp
from jax.experimental import pallas as pl
from jax.experimental.pallas import tpu as pltpu


# ------------------------------- kernels ------------------------------------ #

def _conv1x1_vpu_kernel(x_ref, w_ref, b_ref, o_ref, *, cin, cout):
    """Small-channel path: K=cin contraction unrolled as VPU FMAs (exact f32).

    x_ref: (1, cin, tp)  VMEM    w_ref: (cout, cin) SMEM    b_ref: (cout,) SMEM
    o_ref: (1, cout, tp) VMEM    -- pixels on the 128-lane axis (dense stores).
    """
    for c in range(cout):
        acc = x_ref[0, 0:1, :] * w_ref[c, 0] + b_ref[c]
        for i in range(1, cin):
            acc = acc + x_ref[0, i:i + 1, :] * w_ref[c, i]
        o_ref[0, c:c + 1, :] = acc.astype(o_ref.dtype)


def _conv1x1_mxu_kernel(x_ref, w_ref, b_ref, o_ref):
    """Wide-channel fallback: exact-f32 matmul on the MXU.

    x_ref: (1, cin, tp) VMEM   w_ref: (cout, cin) VMEM   b_ref: (cout, 1) VMEM
    """
    acc = jnp.dot(w_ref[...], x_ref[0],
                  preferred_element_type=jnp.float32,
                  precision=jax.lax.Precision.HIGHEST)
    o_ref[0] = (acc + b_ref[...]).astype(o_ref.dtype)


# --------------------------- tile / VMEM sizing ------------------------------ #

def _vmem_capacity_bytes():
    """Per-core VMEM capacity; conservative fallback if undetectable."""
    try:
        info = pltpu.get_tpu_info()
        cap = getattr(info, "vmem_capacity_bytes", None)
        if cap:
            return int(cap)
    except Exception:
        pass
    try:
        kind = jax.devices()[0].device_kind.lower()
        if "v7" in kind:
            return 64 << 20
        if ("v5" in kind) or ("v6" in kind):
            return 128 << 20
    except Exception:
        pass
    return 64 << 20  # conservative (v7x-safe) default


def _pick_pixel_tile(P, cin, cout, itemsize, vmem_cap):
    """Largest 128-multiple pixel tile that fits a ~40% VMEM budget."""
    budget = (vmem_cap * 2) // 5
    # double-buffered input + output tiles, plus headroom for VPU temporaries
    bytes_per_pixel = (2 * (cin + cout) + 4) * itemsize
    tp = (budget // bytes_per_pixel) // 128 * 128
    tp = max(tp, 128)
    if tp >= P:
        return P  # single full-extent pixel block (legal for any P)
    return tp


# -------------------------------- forward ------------------------------------ #

def out_conv_forward(x_ncdhw, w, b):
    """Pallas implementation of OutConv.forward (NCDHW in, NCDHW out)."""
    N, cin, D, H, W = x_ncdhw.shape
    cout = w.shape[0]
    P = D * H * W
    itemsize = jnp.dtype(x_ncdhw.dtype).itemsize

    x_flat = x_ncdhw.reshape(N, cin, P)          # channel-major, pixels last

    vmem_cap = _vmem_capacity_bytes()
    tp = _pick_pixel_tile(P, cin, cout, itemsize, vmem_cap)

    # v7x has 2 TensorCores: keep >= 2 parallel grid steps when batch == 1.
    if N == 1 and tp >= P and P >= 256:
        tp = min(P, (((P + 1) // 2 + 127) // 128) * 128)

    grid = (N, pl.cdiv(P, tp))

    per_step_io = 2 * (cin + cout) * tp * itemsize     # double-buffered in+out
    vmem_limit = int(min(vmem_cap, max(32 << 20, 2 * per_step_io + (4 << 20))))

    if cin * cout <= 128:
        # Small channels: exact-f32 FMAs on the VPU, scalars from SMEM.
        kernel = functools.partial(_conv1x1_vpu_kernel, cin=cin, cout=cout)
        w_arg = w.reshape(cout, cin).astype(jnp.float32)
        b_arg = b.reshape(cout).astype(jnp.float32)
        w_spec = pl.BlockSpec(memory_space=pltpu.MemorySpace.SMEM)
        b_spec = pl.BlockSpec(memory_space=pltpu.MemorySpace.SMEM)
    else:
        # Wide channels: MXU matmul at HIGHEST precision, weights resident in VMEM.
        kernel = _conv1x1_mxu_kernel
        w_arg = w.reshape(cout, cin).astype(jnp.float32)
        b_arg = b.reshape(cout, 1).astype(jnp.float32)
        w_spec = pl.BlockSpec((cout, cin), lambda n, i: (0, 0))
        b_spec = pl.BlockSpec((cout, 1), lambda n, i: (0, 0))

    y = pl.pallas_call(
        kernel,
        out_shape=jax.ShapeDtypeStruct((N, cout, P), x_ncdhw.dtype),
        grid=grid,
        in_specs=[
            pl.BlockSpec((1, cin, tp), lambda n, i: (n, 0, i)),   # activations
            w_spec,                                               # weight
            b_spec,                                               # bias
        ],
        out_specs=pl.BlockSpec((1, cout, tp), lambda n, i: (n, 0, i)),
        compiler_params=pltpu.CompilerParams(
            dimension_semantics=("parallel", "parallel"),
            vmem_limit_bytes=vmem_limit),
    )(x_flat, w_arg, b_arg)

    return y.reshape(N, cout, D, H, W)


# --------------------------- parameter creation ------------------------------ #

def init_out_conv(key, in_ch, out_ch):
    kw, kb = jax.random.split(key)
    return {
        "w": 0.1 * jax.random.normal(kw, (out_ch, in_ch, 1, 1, 1), jnp.float32),
        "b": 0.1 * jax.random.normal(kb, (out_ch,), jnp.float32),
    }


# ----------------------------- plain-JAX reference --------------------------- #

def ref_out_conv_forward(x_ncdhw, params):
    y = jax.lax.conv_general_dilated(
        x_ncdhw, params["w"], (1, 1, 1), [(0, 0)] * 3,
        dimension_numbers=("NCDHW", "OIDHW", "NCDHW"),
        precision=jax.lax.Precision.HIGHEST)
    return y + params["b"].reshape(1, -1, 1, 1, 1)


# ---------------------------------- main ------------------------------------- #

if __name__ == "__main__":
    in_ch, out_ch = 4, 4
    N, D, H, W = 2, 8, 8, 8                      # P = D*H*W = 512 pixels / batch

    key = jax.random.PRNGKey(0)
    kx, kp = jax.random.split(key)
    x = jax.random.normal(kx, (N, in_ch, D, H, W), jnp.float32)   # NCDHW like PyTorch
    params = init_out_conv(kp, in_ch, out_ch)

    fwd = jax.jit(out_conv_forward)
    y = fwd(x, params["w"], params["b"])
    y = jax.block_until_ready(y)

    assert y.shape == (N, out_ch, D, H, W), y.shape

    y_ref = ref_out_conv_forward(x, params)
    err = float(jnp.max(jnp.abs(y - y_ref)))
    assert jnp.allclose(y, y_ref, rtol=1e-5, atol=1e-5), err

    print("KERNEL_OK")
</pallas_src>

<mosaic_0001>
module attributes {stable_mosaic.version = 11 : i64} {
  func.func @_conv1x1_vpu_kernel(%arg0: i32, %arg1: i32, %arg2: memref<1x4x512xf32, #tpu.memory_space<vmem>>, %arg3: memref<4x4xf32, #tpu.memory_space<smem>>, %arg4: memref<4xf32, #tpu.memory_space<smem>>, %arg5: memref<1x4x512xf32, #tpu.memory_space<vmem>>) attributes {dimension_semantics = [#tpu.dimension_semantics<parallel>, #tpu.dimension_semantics<parallel>], iteration_bounds = array<i64: 2, 1>, scalar_prefetch = 0 : i64, scratch_operands = 0 : i64, tpu.core_type = #tpu.core_type<tc>, window_params = [{transform_indices = @transform_0, window_bounds = array<i64: 1, 4, 512>}, {transform_indices = @transform_1, window_bounds = array<i64: 4, 4>}, {transform_indices = @transform_2, window_bounds = array<i64: 4>}, {transform_indices = @transform_3, window_bounds = array<i64: 1, 4, 512>}]} {
    %c0 = arith.constant 0 : index
    %c0_0 = arith.constant 0 : index
    %c0_1 = arith.constant 0 : index
    %0 = vector.load %arg2[%c0, %c0_0, %c0_1] : memref<1x4x512xf32, #tpu.memory_space<vmem>>, vector<1x1x512xf32>
    %1 = vector.shape_cast %0 : vector<1x1x512xf32> to vector<1x512xf32>
    %c0_2 = arith.constant 0 : index
    %c0_3 = arith.constant 0 : index
    %2 = memref.load %arg3[%c0_2, %c0_3] : memref<4x4xf32, #tpu.memory_space<smem>>
    %3 = vector.broadcast %2 : f32 to vector<1x512xf32>
    %4 = arith.mulf %1, %3 : vector<1x512xf32>
    %c0_4 = arith.constant 0 : index
    %5 = memref.load %arg4[%c0_4] : memref<4xf32, #tpu.memory_space<smem>>
    %6 = vector.broadcast %5 : f32 to vector<1x512xf32>
    %7 = arith.addf %4, %6 : vector<1x512xf32>
    %c0_5 = arith.constant 0 : index
    %c1 = arith.constant 1 : index
    %c0_6 = arith.constant 0 : index
    %8 = vector.load %arg2[%c0_5, %c1, %c0_6] : memref<1x4x512xf32, #tpu.memory_space<vmem>>, vector<1x1x512xf32>
    %9 = vector.shape_cast %8 : vector<1x1x512xf32> to vector<1x512xf32>
    %c0_7 = arith.constant 0 : index
    %c1_8 = arith.constant 1 : index
    %10 = memref.load %arg3[%c0_7, %c1_8] : memref<4x4xf32, #tpu.memory_space<smem>>
    %11 = vector.broadcast %10 : f32 to vector<1x512xf32>
    %12 = arith.mulf %9, %11 : vector<1x512xf32>
    %13 = arith.addf %7, %12 : vector<1x512xf32>
    %c0_9 = arith.constant 0 : index
    %c2 = arith.constant 2 : index
    %c0_10 = arith.constant 0 : index
    %14 = vector.load %arg2[%c0_9, %c2, %c0_10] : memref<1x4x512xf32, #tpu.memory_space<vmem>>, vector<1x1x512xf32>
    %15 = vector.shape_cast %14 : vector<1x1x512xf32> to vector<1x512xf32>
    %c0_11 = arith.constant 0 : index
    %c2_12 = arith.constant 2 : index
    %16 = memref.load %arg3[%c0_11, %c2_12] : memref<4x4xf32, #tpu.memory_space<smem>>
    %17 = vector.broadcast %16 : f32 to vector<1x512xf32>
    %18 = arith.mulf %15, %17 : vector<1x512xf32>
    %19 = arith.addf %13, %18 : vector<1x512xf32>
    %c0_13 = arith.constant 0 : index
    %c3 = arith.constant 3 : index
    %c0_14 = arith.constant 0 : index
    %20 = vector.load %arg2[%c0_13, %c3, %c0_14] : memref<1x4x512xf32, #tpu.memory_space<vmem>>, vector<1x1x512xf32>
    %21 = vector.shape_cast %20 : vector<1x1x512xf32> to vector<1x512xf32>
    %c0_15 = arith.constant 0 : index
    %c3_16 = arith.constant 3 : index
    %22 = memref.load %arg3[%c0_15, %c3_16] : memref<4x4xf32, #tpu.memory_space<smem>>
    %23 = vector.broadcast %22 : f32 to vector<1x512xf32>
    %24 = arith.mulf %21, %23 : vector<1x512xf32>
    %25 = arith.addf %19, %24 : vector<1x512xf32>
    %c0_17 = arith.constant 0 : index
    %c0_18 = arith.constant 0 : index
    %c0_19 = arith.constant 0 : index
    %26 = vector.load %arg5[%c0_17, %c0_18, %c0_19] : memref<1x4x512xf32, #tpu.memory_space<vmem>>, vector<1x1x512xf32>
    %27 = vector.shape_cast %26 : vector<1x1x512xf32> to vector<1x512xf32>
    %28 = vector.shape_cast %25 : vector<1x512xf32> to vector<1x1x512xf32>
    tpu.vector_store %arg5[%c0_17, %c0_18, %c0_19], %28 {strides = array<i32>} : memref<1x4x512xf32, #tpu.memory_space<vmem>>, vector<1x1x512xf32>,
    %c0_20 = arith.constant 0 : index
    %c0_21 = arith.constant 0 : index
    %c0_22 = arith.constant 0 : index
    %29 = vector.load %arg2[%c0_20, %c0_21, %c0_22] : memref<1x4x512xf32, #tpu.memory_space<vmem>>, vector<1x1x512xf32>
    %30 = vector.shape_cast %29 : vector<1x1x512xf32> to vector<1x512xf32>
    %c1_23 = arith.constant 1 : index
    %c0_24 = arith.constant 0 : index
    %31 = memref.load %arg3[%c1_23, %c0_24] : memref<4x4xf32, #tpu.memory_space<smem>>
    %32 = vector.broadcast %31 : f32 to vector<1x512xf32>
    %33 = arith.mulf %30, %32 : vector<1x512xf32>
    %c1_25 = arith.constant 1 : index
    %34 = memref.load %arg4[%c1_25] : memref<4xf32, #tpu.memory_space<smem>>
    %35 = vector.broadcast %34 : f32 to vector<1x512xf32>
    %36 = arith.addf %33, %35 : vector<1x512xf32>
    %c0_26 = arith.constant 0 : index
    %c1_27 = arith.constant 1 : index
    %c0_28 = arith.constant 0 : index
    %37 = vector.load %arg2[%c0_26, %c1_27, %c0_28] : memref<1x4x512xf32, #tpu.memory_space<vmem>>, vector<1x1x512xf32>
    %38 = vector.shape_cast %37 : vector<1x1x512xf32> to vector<1x512xf32>
    %c1_29 = arith.constant 1 : index
    %c1_30 = arith.constant 1 : index
    %39 = memref.load %arg3[%c1_29, %c1_30] : memref<4x4xf32, #tpu.memory_space<smem>>
    %40 = vector.broadcast %39 : f32 to vector<1x512xf32>
    %41 = arith.mulf %38, %40 : vector<1x512xf32>
    %42 = arith.addf %36, %41 : vector<1x512xf32>
    %c0_31 = arith.constant 0 : index
    %c2_32 = arith.constant 2 : index
    %c0_33 = arith.constant 0 : index
    %43 = vector.load %arg2[%c0_31, %c2_32, %c0_33] : memref<1x4x512xf32, #tpu.memory_space<vmem>>, vector<1x1x512xf32>
    %44 = vector.shape_cast %43 : vector<1x1x512xf32> to vector<1x512xf32>
    %c1_34 = arith.constant 1 : index
    %c2_35 = arith.constant 2 : index
    %45 = memref.load %arg3[%c1_34, %c2_35] : memref<4x4xf32, #tpu.memory_space<smem>>
    %46 = vector.broadcast %45 : f32 to vector<1x512xf32>
    %47 = arith.mulf %44, %46 : vector<1x512xf32>
    %48 = arith.addf %42, %47 : vector<1x512xf32>
    %c0_36 = arith.constant 0 : index
    %c3_37 = arith.constant 3 : index
    %c0_38 = arith.constant 0 : index
    %49 = vector.load %arg2[%c0_36, %c3_37, %c0_38] : memref<1x4x512xf32, #tpu.memory_space<vmem>>, vector<1x1x512xf32>
    %50 = vector.shape_cast %49 : vector<1x1x512xf32> to vector<1x512xf32>
    %c1_39 = arith.constant 1 : index
    %c3_40 = arith.constant 3 : index
    %51 = memref.load %arg3[%c1_39, %c3_40] : memref<4x4xf32, #tpu.memory_space<smem>>
    %52 = vector.broadcast %51 : f32 to vector<1x512xf32>
    %53 = arith.mulf %50, %52 : vector<1x512xf32>
    %54 = arith.addf %48, %53 : vector<1x512xf32>
    %c0_41 = arith.constant 0 : index
    %c1_42 = arith.constant 1 : index
    %c0_43 = arith.constant 0 : index
    %55 = vector.load %arg5[%c0_41, %c1_42, %c0_43] : memref<1x4x512xf32, #tpu.memory_space<vmem>>, vector<1x1x512xf32>
    %56 = vector.shape_cast %55 : vector<1x1x512xf32> to vector<1x512xf32>
    %57 = vector.shape_cast %54 : vector<1x512xf32> to vector<1x1x512xf32>
    tpu.vector_store %arg5[%c0_41, %c1_42, %c0_43], %57 {strides = array<i32>} : memref<1x4x512xf32, #tpu.memory_space<vmem>>, vector<1x1x512xf32>,
    %c0_44 = arith.constant 0 : index
    %c0_45 = arith.constant 0 : index
    %c0_46 = arith.constant 0 : index
    %58 = vector.load %arg2[%c0_44, %c0_45, %c0_46] : memref<1x4x512xf32, #tpu.memory_space<vmem>>, vector<1x1x512xf32>
    %59 = vector.shape_cast %58 : vector<1x1x512xf32> to vector<1x512xf32>
    %c2_47 = arith.constant 2 : index
    %c0_48 = arith.constant 0 : index
    %60 = memref.load %arg3[%c2_47, %c0_48] : memref<4x4xf32, #tpu.memory_space<smem>>
    %61 = vector.broadcast %60 : f32 to vector<1x512xf32>
    %62 = arith.mulf %59, %61 : vector<1x512xf32>
    %c2_49 = arith.constant 2 : index
    %63 = memref.load %arg4[%c2_49] : memref<4xf32, #tpu.memory_space<smem>>
    %64 = vector.broadcast %63 : f32 to vector<1x512xf32>
    %65 = arith.addf %62, %64 : vector<1x512xf32>
    %c0_50 = arith.constant 0 : index
    %c1_51 = arith.constant 1 : index
    %c0_52 = arith.constant 0 : index
    %66 = vector.load %arg2[%c0_50, %c1_51, %c0_52] : memref<1x4x512xf32, #tpu.memory_space<vmem>>, vector<1x1x512xf32>
    %67 = vector.shape_cast %66 : vector<1x1x512xf32> to vector<1x512xf32>
    %c2_53 = arith.constant 2 : index
    %c1_54 = arith.constant 1 : index
    %68 = memref.load %arg3[%c2_53, %c1_54] : memref<4x4xf32, #tpu.memory_space<smem>>
    %69 = vector.broadcast %68 : f32 to vector<1x512xf32>
    %70 = arith.mulf %67, %69 : vector<1x512xf32>
    %71 = arith.addf %65, %70 : vector<1x512xf32>
    %c0_55 = arith.constant 0 : index
    %c2_56 = arith.constant 2 : index
    %c0_57 = arith.constant 0 : index
    %72 = vector.load %arg2[%c0_55, %c2_56, %c0_57] : memref<1x4x512xf32, #tpu.memory_space<vmem>>, vector<1x1x512xf32>
    %73 = vector.shape_cast %72 : vector<1x1x512xf32> to vector<1x512xf32>
    %c2_58 = arith.constant 2 : index
    %c2_59 = arith.constant 2 : index
    %74 = memref.load %arg3[%c2_58, %c2_59] : memref<4x4xf32, #tpu.memory_space<smem>>
    %75 = vector.broadcast %74 : f32 to vector<1x512xf32>
    %76 = arith.mulf %73, %75 : vector<1x512xf32>
    %77 = arith.addf %71, %76 : vector<1x512xf32>
    %c0_60 = arith.constant 0 : index
    %c3_61 = arith.constant 3 : index
    %c0_62 = arith.constant 0 : index
    %78 = vector.load %arg2[%c0_60, %c3_61, %c0_62] : memref<1x4x512xf32, #tpu.memory_space<vmem>>, vector<1x1x512xf32>
    %79 = vector.shape_cast %78 : vector<1x1x512xf32> to vector<1x512xf32>
    %c2_63 = arith.constant 2 : index
    %c3_64 = arith.constant 3 : index
    %80 = memref.load %arg3[%c2_63, %c3_64] : memref<4x4xf32, #tpu.memory_space<smem>>
    %81 = vector.broadcast %80 : f32 to vector<1x512xf32>
    %82 = arith.mulf %79, %81 : vector<1x512xf32>
    %83 = arith.addf %77, %82 : vector<1x512xf32>
    %c0_65 = arith.constant 0 : index
    %c2_66 = arith.constant 2 : index
    %c0_67 = arith.constant 0 : index
    %84 = vector.load %arg5[%c0_65, %c2_66, %c0_67] : memref<1x4x512xf32, #tpu.memory_space<vmem>>, vector<1x1x512xf32>
    %85 = vector.shape_cast %84 : vector<1x1x512xf32> to vector<1x512xf32>
    %86 = vector.shape_cast %83 : vector<1x512xf32> to vector<1x1x512xf32>
    tpu.vector_store %arg5[%c0_65, %c2_66, %c0_67], %86 {strides = array<i32>} : memref<1x4x512xf32, #tpu.memory_space<vmem>>, vector<1x1x512xf32>,
    %c0_68 = arith.constant 0 : index
    %c0_69 = arith.constant 0 : index
    %c0_70 = arith.constant 0 : index
    %87 = vector.load %arg2[%c0_68, %c0_69, %c0_70] : memref<1x4x512xf32, #tpu.memory_space<vmem>>, vector<1x1x512xf32>
    %88 = vector.shape_cast %87 : vector<1x1x512xf32> to vector<1x512xf32>
    %c3_71 = arith.constant 3 : index
    %c0_72 = arith.constant 0 : index
    %89 = memref.load %arg3[%c3_71, %c0_72] : memref<4x4xf32, #tpu.memory_space<smem>>
    %90 = vector.broadcast %89 : f32 to vector<1x512xf32>
    %91 = arith.mulf %88, %90 : vector<1x512xf32>
    %c3_73 = arith.constant 3 : index
    %92 = memref.load %arg4[%c3_73] : memref<4xf32, #tpu.memory_space<smem>>
    %93 = vector.broadcast %92 : f32 to vector<1x512xf32>
    %94 = arith.addf %91, %93 : vector<1x512xf32>
    %c0_74 = arith.constant 0 : index
    %c1_75 = arith.constant 1 : index
    %c0_76 = arith.constant 0 : index
    %95 = vector.load %arg2[%c0_74, %c1_75, %c0_76] : memref<1x4x512xf32, #tpu.memory_space<vmem>>, vector<1x1x512xf32>
    %96 = vector.shape_cast %95 : vector<1x1x512xf32> to vector<1x512xf32>
    %c3_77 = arith.constant 3 : index
    %c1_78 = arith.constant 1 : index
    %97 = memref.load %arg3[%c3_77, %c1_78] : memref<4x4xf32, #tpu.memory_space<smem>>
    %98 = vector.broadcast %97 : f32 to vector<1x512xf32>
    %99 = arith.mulf %96, %98 : vector<1x512xf32>
    %100 = arith.addf %94, %99 : vector<1x512xf32>
    %c0_79 = arith.constant 0 : index
    %c2_80 = arith.constant 2 : index
    %c0_81 = arith.constant 0 : index
    %101 = vector.load %arg2[%c0_79, %c2_80, %c0_81] : memref<1x4x512xf32, #tpu.memory_space<vmem>>, vector<1x1x512xf32>
    %102 = vector.shape_cast %101 : vector<1x1x512xf32> to vector<1x512xf32>
    %c3_82 = arith.constant 3 : index
    %c2_83 = arith.constant 2 : index
    %103 = memref.load %arg3[%c3_82, %c2_83] : memref<4x4xf32, #tpu.memory_space<smem>>
    %104 = vector.broadcast %103 : f32 to vector<1x512xf32>
    %105 = arith.mulf %102, %104 : vector<1x512xf32>
    %106 = arith.addf %100, %105 : vector<1x512xf32>
    %c0_84 = arith.constant 0 : index
    %c3_85 = arith.constant 3 : index
    %c0_86 = arith.constant 0 : index
    %107 = vector.load %arg2[%c0_84, %c3_85, %c0_86] : memref<1x4x512xf32, #tpu.memory_space<vmem>>, vector<1x1x512xf32>
    %108 = vector.shape_cast %107 : vector<1x1x512xf32> to vector<1x512xf32>
    %c3_87 = arith.constant 3 : index
    %c3_88 = arith.constant 3 : index
    %109 = memref.load %arg3[%c3_87, %c3_88] : memref<4x4xf32, #tpu.memory_space<smem>>
    %110 = vector.broadcast %109 : f32 to vector<1x512xf32>
    %111 = arith.mulf %108, %110 : vector<1x512xf32>
    %112 = arith.addf %106, %111 : vector<1x512xf32>
    %c0_89 = arith.constant 0 : index
    %c3_90 = arith.constant 3 : index
    %c0_91 = arith.constant 0 : index
    %113 = vector.load %arg5[%c0_89, %c3_90, %c0_91] : memref<1x4x512xf32, #tpu.memory_space<vmem>>, vector<1x1x512xf32>
    %114 = vector.shape_cast %113 : vector<1x1x512xf32> to vector<1x512xf32>
    %115 = vector.shape_cast %112 : vector<1x512xf32> to vector<1x1x512xf32>
    tpu.vector_store %arg5[%c0_89, %c3_90, %c0_91], %115 {strides = array<i32>} : memref<1x4x512xf32, #tpu.memory_space<vmem>>, vector<1x1x512xf32>,
    return
  }
  func.func @transform_0(%arg0: i32, %arg1: i32) -> (i32, i32, i32) {
    %c0_i32 = arith.constant 0 : i32
    %c0_i32_0 = arith.constant 0 : i32
    return %arg0, %c0_i32, %arg1 : i32, i32, i32
  }
  func.func @transform_1(%arg0: i32, %arg1: i32) -> (i32, i32) {
    %c0_i32 = arith.constant 0 : i32
    %c0_i32_0 = arith.constant 0 : i32
    %c0_i32_1 = arith.constant 0 : i32
    return %c0_i32, %c0_i32_0 : i32, i32
  }
  func.func @transform_2(%arg0: i32, %arg1: i32) -> i32 {
    %c0_i32 = arith.constant 0 : i32
    %c0_i32_0 = arith.constant 0 : i32
    return %c0_i32 : i32
  }
  func.func @transform_3(%arg0: i32, %arg1: i32) -> (i32, i32, i32) {
    %c0_i32 = arith.constant 0 : i32
    %c0_i32_0 = arith.constant 0 : i32
    return %arg0, %c0_i32, %arg1 : i32, i32, i32
  }
}

</mosaic_0001>

<bundles_post_ra>
// kernel: out_conv_forward.1
= control target key start
LH: loop header
LB: loop body
LE: loop exit
PB: predicated region body
PF: predicated region fallthrough
CT: control target
= control target key end

     0   :  { %8 = vsyncpa [#allocation3], 0  ;;  %s752_s0 = inlined_call_operand.vmem [shape: f32[2,4,512], index: 0, kind: input, shape index: {}]   ;;  %s753_s1 = inlined_call_operand.vmem [shape: f32[4,4], index: 1, kind: input, shape index: {}]   ;;  %s754_s2 = inlined_call_operand.vmem [shape: f32[4], index: 2, kind: input, shape index: {}]   ;;  %s755_s3 = inlined_call_operand.vmem [shape: f32[2,4,512], index: 3, kind: output, shape index: {}]  }
   0x1   :  { %9 = vsyncpa [#allocation5], 0  ;;  %s627_s12 = smov 0   ;;  %s629_s13 = smov 0  }
   0x2   :  { %s631_s14 = smov 0  }
   0x3 LB: > { %s448_s15 = sadd.s32 4294967295, %s603_s14   ;;  %s27_s16 = sadd.s32 1, %s599_s13  ;;  %s603_s14 = sphi %s631_s14, %s15_s14   ;;  %s599_s13 = sphi %s629_s13, %s767_s13   ;;  %s595_s12 = sphi %s627_s12, %s766_s12  }
   0x4   : > { %p29_p0 = scmp.ge.s32.totalorder %s27_s16, 2  ;;  %p450_p1 = scmp.ge.s32.totalorder %s603_s14, 1 }
   0x5   : > { %p130_p2 = scmp.lt.s32.totalorder %s603_s14, 3  ;;  %p652_p4 = scmp.eq.s32.totalorder %s448_s15, 0 }
   0x6   : > { %s769_s16 = smov (%p29_p0, %s27_s16), 0  ;;  %s143_s21 = sshll.u32 %s753_s1, 4  ;;  %s144_s21 = int_to_ptr.vmem [resolvable:$true] %s143_s21 }
   0x7   : > { %p648_p3 = pnand %p450_p1, %p130_p2  ;;  %s154_s24 = sshll.u32 %s754_s2, 4  ;;  %s155_s24 = int_to_ptr.vmem [resolvable:$true] %s154_s24 }
   0x8   : > { %s760_s18 = scalar_select %p652_p4, 1, 0 }
   0x9   : > { %s759_s17 = scalar_select %p648_p3, 1, 0 }
   0xa   : > { %p506_p5 = pneg %p648_p3  ;;  %s543_s26 = scalar_lea.vmem %s144_s21, 64 }
   0xb   : > { %p544_p7 = scmp.ne.s32.totalorder %s144_s21, %s543_s26  ;;  %p551_p11 = scmp.lt.s32.totalorder %s144_s21, %s144_s21 }
   0xc   : > { %p666_p6 = pnand %p652_p4, %p506_p5  ;;  %p552_p12 = scmp.lt.s32.totalorder %s543_s26, %s543_s26 }
   0xe   : > { %p545_p8 = pneg %p666_p6  ;;  %p553_p13 = por %p552_p12, %p551_p11 }
  0x10   : > { %p546_p9 = pnand %p545_p8, %p544_p7 }
  0x12   : > { %p547_p10 = pneg %p546_p9 }
  0x14   : > { %p554_p0 = pnand %p553_p13, %p547_p10 }
  0x16   : > { %557 = shalt.err (!%p554_p0)
}
  0x17   : > { %s605_s27 = smov [#allocation2]   ;;  %s558_s28 = scalar_lea.vmem %s155_s24, 16 }
  0x18   : > { %509 = dma.vmem_to_smem (!%p666_p6), %s144_s21, 64, %s605_s27, [#allocation3]  }
  0x19   : > { %p559_p1 = scmp.ne.s32.totalorder %s155_s24, %s558_s28  ;;  %p566_p4 = scmp.lt.s32.totalorder %s155_s24, %s155_s24 }
  0x1a   : > { %p567_p3 = scmp.lt.s32.totalorder %s558_s28, %s558_s28 }
  0x1b   : > { %p561_p2 = pnand %p559_p1, %p545_p8 }
  0x1c   : > { %p568_p7 = por %p567_p3, %p566_p4 }
  0x1d   : > { %p562_p5 = pneg %p561_p2 }
  0x1f   : > { %p569_p9 = pnand %p568_p7, %p562_p5 }
  0x21   : > { %572 = shalt.err (!%p569_p9)
}
  0x22   : > { %s606_s29 = smov [#allocation4]   ;;  %p762_p10 = scmp.ne.s32.totalorder %s759_s17, 0 }
  0x23   : > { %512 = dma.vmem_to_smem (!%p666_p6), %s155_s24, 16, %s606_s29, [#allocation5]  }
  0x24   : > { %180 = sbr.rel (%p762_p10) target bundleno = 78 (0x4e), region = 32  ;;  %p763_p11 = scmp.ne.s32.totalorder (!%p762_p10), %s760_s18, 0 }
  0x2b   : > { %586 = dma.done.wait (%p763_p11), [#allocation3], 64  }
  0x2c   : > { %588 = vsyncadd (%p763_p11), [#allocation3], 4294967232 }
  0x2d   : > { %590 = dma.done.wait (%p763_p11), [#allocation5], 16  }
  0x2e   : > { %592 = vsyncadd (%p763_p11), [#allocation5], 4294967280 }
  0x2f   : > { %190 = sfence }
  0x30   : > { %p218_p3 = scmp.lt.s32.totalorder %s595_s12, 1  ;;  %s238_s30 = sld [smem:[#allocation2]]  ;;  %v262_v14 = vlaneseq }
  0x31   : > { %s241_s4 = sld [smem:[#allocation4]]  ;;  %s462_s5 = sld [smem:[#allocation2 + $0x1]] }
  0x32   : > { %s771_s12 = smov (!%p218_p3, %s595_s12), 1  ;;  %s464_s6 = sld [smem:[#allocation2 + $0x2]]  ;;  %vm713_vm0 = vcmp.lt.s32.totalorder %v262_v14, 512 }
  0x33   : > { %s466_s7 = sld [smem:[#allocation2 + $0x3]]  ;;  %s496_s8 = sshll.u32 %s771_s12, 4 }
  0x34   : > { %s467_s9 = sld [smem:[#allocation2 + $0x80]]  ;;  %s696_s15 = scalar_lea.vmem %s752_s0, %s496_s8 }
  0x35   : > { %v237_v0 = vld [vmem:[%s696_s15] ss:$4 sm:$0xf]  ;;  %v461_v2 = vld [vmem:[%s696_s15 + $0x1] ss:$4 sm:$0xf]  ;;  %s711_s25 = scalar_lea.vmem %s755_s3, %s496_s8 }
  0x36   : > { %v239_v1 = vstv %s238_s30  ;;  %v463_v6 = vld [vmem:[%s696_s15 + $0x2] ss:$4 sm:$0xf]  ;;  %v465_v7 = vld [vmem:[%s696_s15 + $0x3] ss:$4 sm:$0xf] }
  0x37   : > { %v240_v3 = vmul.f32 %v239_v1, %v237_v0  ;;  %v242_v4 = vstv %s241_s4  ;;  %v247_v5 = vstv %s462_s5  ;;  %v267_v9 = vld [vmem:[%s696_s15] ss:$4 sm:$0xf]  ;;  %s468_s17 = sld [smem:[#allocation4 + $0x1]]  ;;  %s472_s19 = sld [smem:[#allocation2 + $0x82]] }
  0x38   : > { %v248_v8 = vmul.f32 %v461_v2, %v247_v5  ;;  %v253_v11 = vstv %s464_s6  ;;  %s470_s18 = sld [smem:[#allocation2 + $0x81]]  ;;  %s474_s20 = sld [smem:[#allocation2 + $0x83]]  ;;  %v469_v20 = vld [vmem:[%s696_s15 + $0x1] ss:$4 sm:$0xf] }
  0x39   : > { %v243_v10 = vadd.f32 %v242_v4, %v240_v3  ;;  %v259_v12 = vstv %s466_s7  ;;  %v254_v13 = vmul.f32 %v463_v6, %v253_v11  ;;  %s476_s21 = sld [smem:[#allocation2 + $0x100]]  ;;  %s704_s22 = sld [smem:[#allocation4 + $0x2]]  ;;  %v471_v23 = vld [vmem:[%s696_s15 + $0x2] ss:$4 sm:$0xf] }
  0x3a   : > { %v269_v15 = vstv %s467_s9  ;;  %v260_v17 = vmul.f32 %v465_v7, %v259_v12  ;;  %s479_s26 = sld [smem:[#allocation2 + $0x101]]  ;;  %v473_v27 = vld [vmem:[%s696_s15 + $0x3] ss:$4 sm:$0xf]  ;;  %s481_s27 = sld [smem:[#allocation2 + $0x102]] }
  0x3b   : > { %v249_v16 = vadd.f32 %v248_v8, %v243_v10  ;;  %v270_v18 = vmul.f32 %v269_v15, %v267_v9  ;;  %v291_v30 = vld [vmem:[%s696_s15] ss:$4 sm:$0xf]  ;;  %s483_s12 = sld [smem:[#allocation2 + $0x103]]  ;;  %s485_s28 = sld [smem:[#allocation2 + $0x180]] }
  0x3c   : > { %s723_s29 = sld [smem:[#allocation4 + $0x3]]  ;;  %v478_v36 = vld [vmem:[%s696_s15 + $0x1] ss:$4 sm:$0xf]  ;;  %s488_s30 = sld [smem:[#allocation2 + $0x181]] }
  0x3d   : > { %v255_v19 = vadd.f32 %v254_v13, %v249_v16  ;;  %v272_v22 = vstv %s468_s17  ;;  %v281_v29 = vstv %s472_s19  ;;  %v480_v39 = vld [vmem:[%s696_s15 + $0x2] ss:$4 sm:$0xf]  ;;  %s490_s4 = sld [smem:[#allocation2 + $0x182]]  ;;  %s492_s5 = sld [smem:[#allocation2 + $0x183]] }
  0x3e   : > { %v273_v25 = vadd.f32 %v272_v22, %v270_v18  ;;  %v276_v26 = vstv %s470_s18  ;;  %v282_v31 = vmul.f32 %v471_v23, %v281_v29  ;;  %v286_v32 = vstv %s474_s20  ;;  %v482_v42 = vld [vmem:[%s696_s15 + $0x3] ss:$4 sm:$0xf]  ;;  %v315_v46 = vld [vmem:[%s696_s15] ss:$4 sm:$0xf] }
  0x3f   : > { %v261_v24 = vadd.f32 %v260_v17, %v255_v19  ;;  %v277_v28 = vmul.f32 %v469_v20, %v276_v26  ;;  %v287_v34 = vmul.f32 %v473_v27, %v286_v32  ;;  %v293_v35 = vstv %s476_s21  ;;  %v487_v50 = vld [vmem:[%s696_s15 + $0x1] ss:$4 sm:$0xf]  ;;  %v489_v55 = vld [vmem:[%s696_s15 + $0x2] ss:$4 sm:$0xf] }
  0x40   : > { %v294_v37 = vmul.f32 %v293_v35, %v291_v30  ;;  %v296_v38 = vstv %s704_s22  ;;  %v300_v41 = vstv %s479_s26  ;;  %v305_v45 = vstv %s481_s27  ;;  %v491_v61 = vld [vmem:[%s696_s15 + $0x3] ss:$4 sm:$0xf] }
  0x41   : > { %266 = vst.msk [vmem:[%s711_s25] ss:$4 sm:$0xf] %vm713_vm0, %v261_v24  ;;  %v278_v33 = vadd.f32 %v277_v28, %v273_v25  ;;  %v301_v44 = vmul.f32 %v478_v36, %v300_v41  ;;  %v306_v48 = vmul.f32 %v480_v39, %v305_v45  ;;  %v310_v49 = vstv %s483_s12 }
  0x42   : > { %v297_v43 = vadd.f32 %v296_v38, %v294_v37  ;;  %v311_v52 = vmul.f32 %v482_v42, %v310_v49  ;;  %v317_v53 = vstv %s485_s28  ;;  %v320_v54 = vstv %s723_s29 }
  0x43   : > { %v283_v40 = vadd.f32 %v282_v31, %v278_v33  ;;  %v318_v56 = vmul.f32 %v317_v53, %v315_v46  ;;  %v324_v57 = vstv %s488_s30  ;;  %v329_v60 = vstv %s490_s4 }
  0x44   : > { %v302_v51 = vadd.f32 %v301_v44, %v297_v43  ;;  %v325_v59 = vmul.f32 %v487_v50, %v324_v57  ;;  %v330_v63 = vmul.f32 %v489_v55, %v329_v60  ;;  %v334_v0 = vstv %s492_s5 }
  0x45   : > { %v288_v47 = vadd.f32 %v287_v34, %v283_v40  ;;  %v321_v62 = vadd.f32 %v320_v54, %v318_v56  ;;  %v335_v3 = vmul.f32 %v491_v61, %v334_v0 }
  0x46   : > { %v307_v58 = vadd.f32 %v306_v48, %v302_v51 }
  0x47   : > { %475 = vst.msk [vmem:[%s711_s25 + $0x1] ss:$4 sm:$0xf] %vm713_vm0, %v288_v47  ;;  %v326_v2 = vadd.f32 %v325_v59, %v321_v62 }
  0x48   : > { %v312_v1 = vadd.f32 %v311_v52, %v307_v58 }
  0x49   : > { %v331_v4 = vadd.f32 %v330_v63, %v326_v2 }
  0x4a   : > { %484 = vst.msk [vmem:[%s711_s25 + $0x2] ss:$4 sm:$0xf] %vm713_vm0, %v312_v1 }
  0x4b   : > { %v336_v5 = vadd.f32 %v335_v3, %v331_v4 }
  0x4d   : > { %493 = vst.msk [vmem:[%s711_s25 + $0x3] ss:$4 sm:$0xf] %vm713_vm0, %v336_v5 }
  0x4e PF: > { %s15_s14 = sadd.s32 1, %s603_s14   ;;  %s766_s12 = smov %s599_s13 }
  0x4f   : > { %p12_p4 = scmp.ge.s32.totalorder %s15_s14, 4   ;;  %s767_s13 = smov %s769_s16 }
  0x51   :  { %14 = sbr.rel (!%p12_p4) target bundleno = 3 (0x3), region = 77 }
  0x58   :  { %369 = vsyncpa [#allocation3], 1 }
  0x59   :  { %371 = vsyncpa [#allocation3 + $0x1], 1 }
  0x5a   :  { %372 = vsyncpa [#allocation5], 1 }

</bundles_post_ra>
